<compile_context>
chip_gen: v5e
topology: v5e:2x2
jax: 0.10.0
libtpu: 0.0.40
codegen_flags: <defaults>
</compile_context>

<pallas_src>
import functools
import math

import jax
import jax.numpy as jnp
from jax import lax
from jax.experimental import pallas as pl
from jax.experimental.pallas import tpu as pltpu

_INV_SQRT2 = 0.7071067811865476  # 1/sqrt(2)
_LANE = 128
_SUBLANE = 8


def _round_up(v, m):
    return ((v + m - 1) // m) * m


def _gelu_exact(x):
    # Matches torch.nn.functional.gelu default (erf form, not tanh approx).
    return 0.5 * x * (1.0 + lax.erf(x * _INV_SQRT2))


@functools.lru_cache(maxsize=1)
def _vmem_budget():
    """Generation-aware VMEM budget: 75% of physical, 48 MiB fallback (v7x-safe)."""
    cap = 64 * 1024 * 1024
    try:
        cap = int(getattr(pltpu.get_tpu_info(), "vmem_capacity_bytes", cap))
    except Exception:
        pass
    return int(cap * 0.75)


def _choose_row_tile(rows, per_row_bytes, resident_bytes, budget, max_tile=512):
    """Largest row tile (multiple of 8, <= rows, <= max_tile) fitting the VMEM
    budget, capped so the row grid keeps >=4 steps when rows allow (v7x has 2
    TensorCores that only share the 'parallel' axis with >=2 grid steps)."""
    tm = min(max_tile, _round_up(rows, _SUBLANE))
    if rows >= 4 * _SUBLANE:
        tm = min(tm, _round_up(pl.cdiv(rows, 4), _SUBLANE))
    while tm > _SUBLANE and resident_bytes + tm * per_row_bytes > budget:
        tm = max(_SUBLANE, _round_up(tm // 2, _SUBLANE))
    return tm


# ---------------------------------------------------------------------------
# Pallas kernels (bf16 matmul operands, f32 accumulation / element-wise math)
# ---------------------------------------------------------------------------

def _mlp_kernel_proj(x_ref, w_xf_ref, b_xf_ref, w_hid_ref, b_hid_ref,
                     w_out_ref, b_out_ref, o_ref, *, hp, out_gelu):
    """MLP with skip projection: x @ [W_in|W_proj] -> GELU / skip -> hid -> +skip -> lin_out."""
    x = x_ref[...]                                              # bf16 tile
    z = jnp.dot(x, w_xf_ref[...], preferred_element_type=jnp.float32) + b_xf_ref[...]
    h = _gelu_exact(z[:, :hp])                                  # lin_in + GELU
    skip = z[:, hp:]                                            # proj(skip)
    h = jnp.dot(h.astype(jnp.bfloat16), w_hid_ref[...],
                preferred_element_type=jnp.float32) + b_hid_ref[...]
    y = skip + _gelu_exact(h)                                   # dropout == identity
    out = jnp.dot(y.astype(jnp.bfloat16), w_out_ref[...],
                  preferred_element_type=jnp.float32) + b_out_ref[...]
    if out_gelu:
        out = _gelu_exact(out)                                  # fused embedder epilogue
    o_ref[...] = out.astype(o_ref.dtype)


def _mlp_kernel_noproj(x_ref, w_in_ref, b_in_ref, w_hid_ref, b_hid_ref,
                       w_out_ref, b_out_ref, o_ref, *, out_gelu):
    """MLP with identity skip (n_points == hidden_size)."""
    x = x_ref[...]
    h = jnp.dot(x, w_in_ref[...], preferred_element_type=jnp.float32) + b_in_ref[...]
    h = _gelu_exact(h)
    h = jnp.dot(h.astype(jnp.bfloat16), w_hid_ref[...],
                preferred_element_type=jnp.float32) + b_hid_ref[...]
    y = x.astype(jnp.float32) + _gelu_exact(h)
    out = jnp.dot(y.astype(jnp.bfloat16), w_out_ref[...],
                  preferred_element_type=jnp.float32) + b_out_ref[...]
    if out_gelu:
        out = _gelu_exact(out)
    o_ref[...] = out.astype(o_ref.dtype)


def _sage_resnet_kernel(ax_ref, w_ref, b_ref, o_ref, *, fp):
    """GCNResnet dense part: x + GELU(lin_l(agg) + lin_r(x)).

    ax = [agg | x] (tm, 2*fp) against stacked [[W_l],[W_r]] (2*fp, fp): one MXU
    op with K=256; the residual x is the lane slice [:, fp:]."""
    ax = ax_ref[...]                                            # bf16
    y = jnp.dot(ax, w_ref[...], preferred_element_type=jnp.float32) + b_ref[...]
    x = ax[:, fp:].astype(jnp.float32)
    o_ref[...] = (x + _gelu_exact(y)).astype(o_ref.dtype)


def _head_kernel(q_ref, w_xf0, b_xf0, w_hid0, b_hid0, w_out0, b_out0,
                 w_in1, b_in1, w_hid1, b_hid1, w_or1, b_o1, o_ref, *, hp0):
    """Fused prediction head: lin0-MLP (proj) -> ReLU -> lin1-MLP (identity skip)
    with lin1's single output column done as a VPU multiply + lane reduction."""
    q = q_ref[...]                                              # bf16
    # ---- lin0 MLP (3c -> 2c, has proj) ----
    z = jnp.dot(q, w_xf0[...], preferred_element_type=jnp.float32) + b_xf0[...]
    h = _gelu_exact(z[:, :hp0])
    skip = z[:, hp0:]
    h = jnp.dot(h.astype(jnp.bfloat16), w_hid0[...],
                preferred_element_type=jnp.float32) + b_hid0[...]
    y = skip + _gelu_exact(h)
    y = jnp.dot(y.astype(jnp.bfloat16), w_out0[...],
                preferred_element_type=jnp.float32) + b_out0[...]
    # ---- nn.ReLU ----
    y = jnp.maximum(y, 0.0)
    # ---- lin1 MLP (2c -> 1, identity skip) ----
    h = jnp.dot(y.astype(jnp.bfloat16), w_in1[...],
                preferred_element_type=jnp.float32) + b_in1[...]
    h = _gelu_exact(h)
    h = jnp.dot(h.astype(jnp.bfloat16), w_hid1[...],
                preferred_element_type=jnp.float32) + b_hid1[...]
    y = y + _gelu_exact(h)
    out = jnp.sum(y * w_or1[...], axis=-1, keepdims=True) + b_o1[...]
    o_ref[...] = out.astype(o_ref.dtype)


# ---------------------------------------------------------------------------
# Parameter init (nn.Linear-style uniform fan-in) + padding / fusion prep
# ---------------------------------------------------------------------------

def init_linear(key, fan_in, fan_out, dtype=jnp.float32):
    kw, kb = jax.random.split(key)
    bound = 1.0 / math.sqrt(fan_in)
    w = jax.random.uniform(kw, (fan_in, fan_out), dtype, -bound, bound)
    b = jax.random.uniform(kb, (fan_out,), dtype, -bound, bound)
    return {"w": w, "b": b}


def init_mlp(key, n_points, output_size, hidden_size, dtype=jnp.float32):
    ks = jax.random.split(key, 4)
    p = {"lin_in": init_linear(ks[0], n_points, hidden_size, dtype),
         "hid": init_linear(ks[1], hidden_size, hidden_size, dtype),
         "lin_out": init_linear(ks[2], hidden_size, output_size, dtype)}
    if n_points > hidden_size:
        p["proj"] = init_linear(ks[3], n_points, hidden_size, dtype)
    return p


def init_sage_resnet(key, f_in, f_out, dtype=jnp.float32):
    assert f_in == f_out  # GCN only uses in == out; no proj branch needed
    k1, k2 = jax.random.split(key)
    return {"lin_l": init_linear(k1, f_in, f_out, dtype),               # bias
            "lin_r": {"w": init_linear(k2, f_in, f_out, dtype)["w"]}}   # no bias


def _pad2(a, rp, cp):
    return jnp.pad(a, ((0, rp - a.shape[0]), (0, cp - a.shape[1])))


def _wpad(lin, rp, cp):
    """Zero-pad a Linear to (rp, cp); weight -> bf16, bias -> f32 (1, cp) row."""
    w = _pad2(lin["w"], rp, cp).astype(jnp.bfloat16)
    b = jnp.pad(lin["b"], (0, cp - lin["b"].shape[0])).astype(jnp.float32).reshape(1, cp)
    return w, b


def prepare_mlp(params, n_points, output_size, hidden_size):
    np_ = _round_up(n_points, _LANE)
    hp = _round_up(hidden_size, _LANE)
    op = _round_up(output_size, _LANE)
    has_proj = n_points > hidden_size
    if not has_proj:
        assert n_points == hidden_size, "identity skip needs n_points == hidden_size"

    w_in, b_in = _wpad(params["lin_in"], np_, hp)
    w_hid, b_hid = _wpad(params["hid"], hp, hp)
    w_out, b_out = _wpad(params["lin_out"], hp, op)

    prep = {"n_in": n_points, "n_out": output_size,
            "np": np_, "hp": hp, "op": op, "has_proj": has_proj,
            "w_hid": w_hid, "b_hid": b_hid, "w_out": w_out, "b_out": b_out}
    if has_proj:
        w_pr, b_pr = _wpad(params["proj"], np_, hp)
        prep["w_xf"] = jnp.concatenate([w_in, w_pr], axis=1)   # (np_, 2*hp)
        prep["b_xf"] = jnp.concatenate([b_in, b_pr], axis=1)   # (1, 2*hp)
    else:
        prep["w_in"], prep["b_in"] = w_in, b_in
    return prep


def prepare_sage_resnet(params, f_in, f_out):
    assert f_in == f_out
    fp = _round_up(f_out, _LANE)
    w_l = _pad2(params["lin_l"]["w"], fp, fp)
    w_r = _pad2(params["lin_r"]["w"], fp, fp)
    return {"f_out": f_out, "fp": fp,
            "w": jnp.concatenate([w_l, w_r], axis=0).astype(jnp.bfloat16),  # (2fp, fp)
            "b": jnp.pad(params["lin_l"]["b"], (0, fp - f_out))
                    .astype(jnp.float32).reshape(1, fp)}


def prepare_head(p0, p1, out_channels):
    """Fused lin0 -> ReLU -> lin1 head weights (lane padded, bf16 matmul operands)."""
    c = out_channels
    n0, h0 = 3 * c, 2 * c            # lin0: MLP(3c -> 2c, hidden 2c): has proj
    n1, h1 = 2 * c, 2 * c            # lin1: MLP(2c -> 1, hidden 2c): identity skip
    assert n0 > h0 and n1 == h1
    np0, hp0 = _round_up(n0, _LANE), _round_up(h0, _LANE)
    op0, hp1 = _round_up(h0, _LANE), _round_up(h1, _LANE)
    assert op0 == hp1 == _round_up(n1, _LANE)

    w_in0, b_in0 = _wpad(p0["lin_in"], np0, hp0)
    w_pr0, b_pr0 = _wpad(p0["proj"], np0, hp0)
    w_hid0, b_hid0 = _wpad(p0["hid"], hp0, hp0)
    w_out0, b_out0 = _wpad(p0["lin_out"], hp0, op0)
    w_in1, b_in1 = _wpad(p1["lin_in"], op0, hp1)
    w_hid1, b_hid1 = _wpad(p1["hid"], hp1, hp1)
    # lin1.lin_out has one useful output column -> f32 lane row + scalar bias
    w_or1 = jnp.pad(p1["lin_out"]["w"][:, 0], (0, hp1 - h1)) \
               .astype(jnp.float32).reshape(1, hp1)
    b_o1 = p1["lin_out"]["b"].astype(jnp.float32).reshape(1, 1)

    weights = (jnp.concatenate([w_in0, w_pr0], axis=1),
               jnp.concatenate([b_in0, b_pr0], axis=1),
               w_hid0, b_hid0, w_out0, b_out0,
               w_in1, b_in1, w_hid1, b_hid1, w_or1, b_o1)
    return {"n_in": n0, "np0": np0, "hp0": hp0, "weights": weights}


# ---------------------------------------------------------------------------
# Pallas wrappers
# ---------------------------------------------------------------------------

def mlp_forward(prep, x, apply_output_gelu=False):
    """Fused MLP forward (eval-mode dropout). x: (..., n_points)."""
    # TODO(synk): nn.Dropout is eval-mode identity; the training mask is not reproduced.
    lead = x.shape[:-1]
    n_in, n_out = prep["n_in"], prep["n_out"]
    np_, hp, op = prep["np"], prep["hp"], prep["op"]
    x2 = x.reshape((-1, n_in))
    rows = x2.shape[0]
    rows8 = _round_up(rows, _SUBLANE)
    # Single pad: rows to the 8-sublane multiple, lanes to 128 (exact: zeros stay
    # closed under matmul/bias/GELU in the padded columns).
    x_p = jnp.pad(x2.astype(jnp.bfloat16), ((0, rows8 - rows), (0, np_ - n_in)))

    if prep["has_proj"]:
        kernel = functools.partial(_mlp_kernel_proj, hp=hp, out_gelu=apply_output_gelu)
        weights = (prep["w_xf"], prep["b_xf"], prep["w_hid"], prep["b_hid"],
                   prep["w_out"], prep["b_out"])
        nxf = 2 * hp
    else:
        kernel = functools.partial(_mlp_kernel_noproj, out_gelu=apply_output_gelu)
        weights = (prep["w_in"], prep["b_in"], prep["w_hid"], prep["b_hid"],
                   prep["w_out"], prep["b_out"])
        nxf = hp

    budget = _vmem_budget()
    w_bytes = 2 * sum(int(w.size) * w.dtype.itemsize for w in weights)  # dbl-buffered
    # live per-row bytes: bf16 x/out tiles (double-buffered) + f32 intermediates
    # (z: nxf, h/skip/y: 3*hp, erf temps ~2*hp, out: op) -- fixed accounting.
    per_row = 2 * 2 * (np_ + op) + 4 * (nxf + 5 * hp + op)
    tm = _choose_row_tile(rows8, per_row, w_bytes, budget)
    grid = (pl.cdiv(rows8, tm),)

    in_specs = [pl.BlockSpec((tm, np_), lambda i: (i, 0))]
    in_specs += [pl.BlockSpec(w.shape, lambda i: (0, 0)) for w in weights]  # resident

    out = pl.pallas_call(
        kernel,
        out_shape=jax.ShapeDtypeStruct((rows8, op), jnp.bfloat16),
        grid=grid,
        in_specs=in_specs,
        out_specs=pl.BlockSpec((tm, op), lambda i: (i, 0)),
        compiler_params=pltpu.CompilerParams(
            dimension_semantics=("parallel",), vmem_limit_bytes=budget),
        cost_estimate=pl.CostEstimate(
            flops=2 * rows8 * (np_ * nxf + hp * hp + hp * op),
            transcendentals=(2 + int(apply_output_gelu)) * rows8 * hp,
            bytes_accessed=2 * rows8 * (np_ + op) + w_bytes),
    )(x_p, *weights)
    return out[:rows, :n_out].reshape(lead + (n_out,))


def sage_resnet_forward(prep, x, edge_index):
    """GCNResnet: SAGEConv(mean) -> dropout(id) -> x + GELU(conv)."""
    f_out, fp = prep["f_out"], prep["fp"]
    n = x.shape[0]
    x32 = x.astype(jnp.float32)
    src, dst = edge_index[0], edge_index[1]
    # TODO(synk): the neighborhood gather + scatter-mean stays in XLA; fusing it needs
    # scalar-prefetched edge lists + manual DMA row gathers (data-dependent scatter).
    agg = jax.ops.segment_sum(x32[src], dst, num_segments=n)
    cnt = jax.ops.segment_sum(jnp.ones((src.shape[0],), jnp.float32), dst, num_segments=n)
    agg = agg / jnp.maximum(cnt, 1.0)[:, None]

    rows8 = _round_up(n, _SUBLANE)
    # [agg | x] with each half lane-padded to fp so the stacked weight halves line up.
    ax = jnp.concatenate(
        [jnp.pad(agg, ((0, rows8 - n), (0, fp - f_out))),
         jnp.pad(x32, ((0, rows8 - n), (0, fp - f_out)))], axis=-1).astype(jnp.bfloat16)

    budget = _vmem_budget()
    w_bytes = 2 * (int(prep["w"].size) * 2 + int(prep["b"].size) * 4)
    per_row = 2 * 2 * (2 * fp + fp) + 4 * (3 * fp)
    tm = _choose_row_tile(rows8, per_row, w_bytes, budget)
    grid = (pl.cdiv(rows8, tm),)

    out = pl.pallas_call(
        functools.partial(_sage_resnet_kernel, fp=fp),
        out_shape=jax.ShapeDtypeStruct((rows8, fp), jnp.bfloat16),
        grid=grid,
        in_specs=[pl.BlockSpec((tm, 2 * fp), lambda i: (i, 0)),
                  pl.BlockSpec(prep["w"].shape, lambda i: (0, 0)),
                  pl.BlockSpec(prep["b"].shape, lambda i: (0, 0))],
        out_specs=pl.BlockSpec((tm, fp), lambda i: (i, 0)),
        compiler_params=pltpu.CompilerParams(
            dimension_semantics=("parallel",), vmem_limit_bytes=budget),
        cost_estimate=pl.CostEstimate(
            flops=2 * rows8 * 2 * fp * fp,
            transcendentals=rows8 * fp,
            bytes_accessed=2 * rows8 * 3 * fp + w_bytes),
    )(ax, prep["w"], prep["b"])
    return out[:n, :f_out]


def head_forward(prep, q):
    """Fused prediction head on stacked [xy; yx] rows -> (rows, 1) f32."""
    n_in, np0, hp0 = prep["n_in"], prep["np0"], prep["hp0"]
    weights = prep["weights"]
    rows = q.shape[0]
    rows8 = _round_up(rows, _SUBLANE)
    q_p = jnp.pad(q.astype(jnp.bfloat16), ((0, rows8 - rows), (0, np0 - n_in)))

    budget = _vmem_budget()
    w_bytes = 2 * sum(int(w.size) * w.dtype.itemsize for w in weights)
    per_row = 2 * 2 * (np0 + 1) + 4 * (2 * hp0 + 6 * hp0)
    tm = _choose_row_tile(rows8, per_row, w_bytes, budget)
    grid = (pl.cdiv(rows8, tm),)

    in_specs = [pl.BlockSpec((tm, np0), lambda i: (i, 0))]
    in_specs += [pl.BlockSpec(w.shape, lambda i: (0, 0)) for w in weights]

    out = pl.pallas_call(
        functools.partial(_head_kernel, hp0=hp0),
        out_shape=jax.ShapeDtypeStruct((rows8, 1), jnp.float32),
        grid=grid,
        in_specs=in_specs,
        out_specs=pl.BlockSpec((tm, 1), lambda i: (i, 0)),
        compiler_params=pltpu.CompilerParams(
            dimension_semantics=("parallel",), vmem_limit_bytes=budget),
        cost_estimate=pl.CostEstimate(
            flops=2 * rows8 * (np0 * 2 * hp0 + 4 * hp0 * hp0 + hp0),
            transcendentals=4 * rows8 * hp0,
            bytes_accessed=2 * rows8 * np0 + 4 * rows8 + w_bytes),
    )(q_p, *weights)
    return out[:rows]


# ---------------------------------------------------------------------------
# Full GCN forward (mirrors the PyTorch GCN.forward; eval mode)
# ---------------------------------------------------------------------------

def init_gcn(key, nb_points, out_channels, dtype=jnp.float32):
    ks = jax.random.split(key, 7)
    c, h = out_channels, out_channels * 2
    return {
        "emb_mlp": init_mlp(ks[0], nb_points, nb_points, h, dtype),
        "emb_rho": init_mlp(ks[1], nb_points, c, h, dtype),
        "conv1": init_sage_resnet(ks[2], c, c, dtype),
        "conv2": init_sage_resnet(ks[3], c, c, dtype),
        "conv3": init_sage_resnet(ks[4], c, c, dtype),
        "lin0": init_mlp(ks[5], 3 * c, 2 * c, 2 * c, dtype),
        "lin1": init_mlp(ks[6], 2 * c, 1, 2 * c, dtype),
    }


def prepare_gcn(raw, nb_points, out_channels):
    c, h = out_channels, out_channels * 2
    return {
        "emb_mlp": prepare_mlp(raw["emb_mlp"], nb_points, nb_points, h),
        "emb_rho": prepare_mlp(raw["emb_rho"], nb_points, c, h),
        "conv1": prepare_sage_resnet(raw["conv1"], c, c),
        "conv2": prepare_sage_resnet(raw["conv2"], c, c),
        "conv3": prepare_sage_resnet(raw["conv3"], c, c),
        "head": prepare_head(raw["lin0"], raw["lin1"], c),
    }


def gcn_forward(prep, batch, x, edge_index, src_idx, dst_idx, num_graphs):
    # Embedder: per-point MLP -> GELU (fused epilogue) -> sum over point set -> rho MLP
    h = mlp_forward(prep["emb_mlp"], x, apply_output_gelu=True)
    h = h.astype(jnp.float32).sum(axis=-2)
    x_nodes = mlp_forward(prep["emb_rho"], h)

    # note: GCN.forward defines `self.bn` but never applies it.
    x1 = sage_resnet_forward(prep["conv1"], x_nodes, edge_index)
    x2 = sage_resnet_forward(prep["conv2"], x1, edge_index)
    node_emb = sage_resnet_forward(prep["conv3"], x2, edge_index)

    # TODO(synk): global_max_pool + node-index gathers are data-dependent; left in XLA.
    node32 = node_emb.astype(jnp.float32)
    graph_emb = jax.ops.segment_max(node32, batch, num_segments=num_graphs)[batch]
    src_emb, dst_emb = node32[src_idx], node32[dst_idx]
    graph_q = graph_emb[src_idx]
    xy = jnp.concatenate([src_emb, dst_emb, graph_q], axis=-1)
    yx = jnp.concatenate([dst_emb, src_emb, graph_q], axis=-1)

    # Both heads share weights -> stack rows, one fused lin0->ReLU->lin1 kernel launch.
    q = jnp.concatenate([xy, yx], axis=0)
    preds = head_forward(prep["head"], q)
    nq = xy.shape[0]
    return (preds[:nq], preds[nq:]), xy


# ---------------------------------------------------------------------------
# Pure-JAX f32 reference (mirrors the PyTorch forward, eval mode)
# ---------------------------------------------------------------------------

def _ref_linear(lin, x):
    return x @ lin["w"] + lin["b"]


def _ref_mlp(p, x, n_points, hidden):
    skip = x
    h = _gelu_exact(_ref_linear(p["lin_in"], x))
    h = _ref_linear(p["hid"], h)
    if n_points > hidden:
        skip = _ref_linear(p["proj"], skip)
    return _ref_linear(p["lin_out"], skip + _gelu_exact(h))


def _ref_sage_resnet(p, x, edge_index):
    n = x.shape[0]
    src, dst = edge_index[0], edge_index[1]
    agg = jax.ops.segment_sum(x[src], dst, num_segments=n)
    cnt = jax.ops.segment_sum(jnp.ones((src.shape[0],), x.dtype), dst, num_segments=n)
    agg = agg / jnp.maximum(cnt, 1.0)[:, None]
    y = _ref_linear(p["lin_l"], agg) + x @ p["lin_r"]["w"]
    return x + _gelu_exact(y)


def gcn_reference(raw, batch, x, edge_index, src_idx, dst_idx, num_graphs,
                  nb_points, out_channels):
    c = out_channels
    h = 2 * c
    z = _gelu_exact(_ref_mlp(raw["emb_mlp"], x, nb_points, h)).sum(-2)
    xn = _ref_mlp(raw["emb_rho"], z, nb_points, h)
    xn = _ref_sage_resnet(raw["conv1"], xn, edge_index)
    xn = _ref_sage_resnet(raw["conv2"], xn, edge_index)
    node = _ref_sage_resnet(raw["conv3"], xn, edge_index)
    ge = jax.ops.segment_max(node, batch, num_segments=num_graphs)[batch]
    s, d, g = node[src_idx], node[dst_idx], ge[src_idx]
    xy = jnp.concatenate([s, d, g], -1)
    yx = jnp.concatenate([d, s, g], -1)

    def lin_head(q):
        q = _ref_mlp(raw["lin0"], q, 3 * c, 2 * c)
        q = jnp.maximum(q, 0.0)
        return _ref_mlp(raw["lin1"], q, 2 * c, 2 * c)

    return (lin_head(xy), lin_head(yx)), xy


# ---------------------------------------------------------------------------
# Demo / self-check
# ---------------------------------------------------------------------------

def _check(name, a, b, tol=5e-2):
    """Scale-aware max-error check (bf16 matmul operands vs f32 reference)."""
    a = jnp.asarray(a, jnp.float32)
    b = jnp.asarray(b, jnp.float32)
    err = float(jnp.max(jnp.abs(a - b)))
    scale = float(jnp.max(jnp.abs(b))) + 1e-6
    assert err <= tol * scale, f"{name} mismatch: max_err={err:.4e} scale={scale:.4e}"


if __name__ == "__main__":
    nb_points, out_channels = 64, 16
    num_nodes, set_size, num_graphs = 12, 4, 2
    num_edges, num_queries = 24, 6

    key = jax.random.PRNGKey(0)
    k_param, k_x, k_e, k_q = jax.random.split(key, 4)
    raw = init_gcn(k_param, nb_points, out_channels)
    prep = prepare_gcn(raw, nb_points, out_channels)

    x = jax.random.normal(k_x, (num_nodes, set_size, nb_points), jnp.float32)
    batch = jnp.repeat(jnp.arange(num_graphs, dtype=jnp.int32),
                       num_nodes // num_graphs)
    k_e1, k_e2 = jax.random.split(k_e)
    e_g0 = jax.random.randint(k_e1, (2, num_edges // 2), 0, num_nodes // 2, jnp.int32)
    e_g1 = jax.random.randint(k_e2, (2, num_edges // 2), num_nodes // 2, num_nodes, jnp.int32)
    edge_index = jnp.concatenate([e_g0, e_g1], axis=1)
    qidx = jax.random.randint(k_q, (2, num_queries), 0, num_nodes, jnp.int32)
    src_idx, dst_idx = qidx[0], qidx[1]

    (predxy, predyx), xy = gcn_forward(prep, batch, x, edge_index,
                                       src_idx, dst_idx, num_graphs)
    predxy, predyx, xy = jax.block_until_ready((predxy, predyx, xy))

    (rxy, ryx), rq = gcn_reference(raw, batch, x, edge_index, src_idx, dst_idx,
                                   num_graphs, nb_points, out_channels)

    assert predxy.shape == (num_queries, 1) and predyx.shape == (num_queries, 1)
    assert xy.shape == (num_queries, 3 * out_channels)
    _check("predxy", predxy, rxy)
    _check("predyx", predyx, ryx)
    _check("xy", xy, rq)

    print("KERNEL_OK")
</pallas_src>

<mosaic_0001>
module attributes {stable_mosaic.version = 11 : i64} {
  func.func @_mlp_kernel_proj(%arg0: i32, %arg1: memref<16x128xbf16, #tpu.memory_space<vmem>>, %arg2: memref<128x256xbf16, #tpu.memory_space<vmem>>, %arg3: memref<1x256xf32, #tpu.memory_space<vmem>>, %arg4: memref<128x128xbf16, #tpu.memory_space<vmem>>, %arg5: memref<1x128xf32, #tpu.memory_space<vmem>>, %arg6: memref<128x128xbf16, #tpu.memory_space<vmem>>, %arg7: memref<1x128xf32, #tpu.memory_space<vmem>>, %arg8: memref<16x128xbf16, #tpu.memory_space<vmem>>) attributes {dimension_semantics = [#tpu.dimension_semantics<parallel>], iteration_bounds = array<i64: 3>, scalar_prefetch = 0 : i64, scratch_operands = 0 : i64, tpu.core_type = #tpu.core_type<tc>, window_params = [{transform_indices = @transform_0, window_bounds = array<i64: 16, 128>}, {pipeline_mode = #tpu.pipeline_mode<synchronous>, transform_indices = @transform_1, window_bounds = array<i64: 128, 256>}, {pipeline_mode = #tpu.pipeline_mode<synchronous>, transform_indices = @transform_2, window_bounds = array<i64: 1, 256>}, {pipeline_mode = #tpu.pipeline_mode<synchronous>, transform_indices = @transform_3, window_bounds = array<i64: 128, 128>}, {pipeline_mode = #tpu.pipeline_mode<synchronous>, transform_indices = @transform_4, window_bounds = array<i64: 1, 128>}, {pipeline_mode = #tpu.pipeline_mode<synchronous>, transform_indices = @transform_5, window_bounds = array<i64: 128, 128>}, {pipeline_mode = #tpu.pipeline_mode<synchronous>, transform_indices = @transform_6, window_bounds = array<i64: 1, 128>}, {transform_indices = @transform_7, window_bounds = array<i64: 16, 128>}]} {
    %c0 = arith.constant 0 : index
    %c0_0 = arith.constant 0 : index
    %0 = vector.load %arg1[%c0, %c0_0] : memref<16x128xbf16, #tpu.memory_space<vmem>>, vector<16x128xbf16>
    %c0_1 = arith.constant 0 : index
    %c0_2 = arith.constant 0 : index
    %1 = vector.load %arg2[%c0_1, %c0_2] : memref<128x256xbf16, #tpu.memory_space<vmem>>, vector<128x256xbf16>
    %cst = arith.constant dense<0.000000e+00> : vector<16x256xf32>
    %2 = tpu.matmul %0, %1, %cst {dimension_numbers = #tpu.dot_dimension_numbers<[1], [0], [0], [1], [0, 0, 1, 1], [], []>} : vector<16x128xbf16>, vector<128x256xbf16>, vector<16x256xf32> -> vector<16x256xf32>
    %c0_3 = arith.constant 0 : index
    %c0_4 = arith.constant 0 : index
    %3 = vector.load %arg3[%c0_3, %c0_4] : memref<1x256xf32, #tpu.memory_space<vmem>>, vector<1x256xf32>
    %4 = vector.broadcast %3 : vector<1x256xf32> to vector<16x256xf32>
    %5 = arith.addf %2, %4 : vector<16x256xf32>
    %6 = vector.extract_strided_slice %5 {offsets = [0, 0], sizes = [16, 128], strides = [1, 1]} : vector<16x256xf32> to vector<16x128xf32>
    %cst_5 = arith.constant 5.000000e-01 : f32
    %7 = vector.broadcast %cst_5 : f32 to vector<16x128xf32>
    %8 = arith.mulf %7, %6 : vector<16x128xf32>
    %cst_6 = arith.constant 0.707106769 : f32
    %9 = vector.broadcast %cst_6 : f32 to vector<16x128xf32>
    %10 = arith.mulf %6, %9 : vector<16x128xf32>
    %11 = math.erf %10 : vector<16x128xf32>
    %cst_7 = arith.constant 1.000000e+00 : f32
    %12 = vector.broadcast %cst_7 : f32 to vector<16x128xf32>
    %13 = arith.addf %12, %11 : vector<16x128xf32>
    %14 = arith.mulf %8, %13 : vector<16x128xf32>
    %15 = vector.extract_strided_slice %5 {offsets = [0, 128], sizes = [16, 128], strides = [1, 1]} : vector<16x256xf32> to vector<16x128xf32>
    %16 = arith.truncf %14 : vector<16x128xf32> to vector<16x128xbf16>
    %c0_8 = arith.constant 0 : index
    %c0_9 = arith.constant 0 : index
    %17 = vector.load %arg4[%c0_8, %c0_9] : memref<128x128xbf16, #tpu.memory_space<vmem>>, vector<128x128xbf16>
    %cst_10 = arith.constant dense<0.000000e+00> : vector<16x128xf32>
    %18 = tpu.matmul %16, %17, %cst_10 {dimension_numbers = #tpu.dot_dimension_numbers<[1], [0], [0], [1], [0, 0, 1, 1], [], []>} : vector<16x128xbf16>, vector<128x128xbf16>, vector<16x128xf32> -> vector<16x128xf32>
    %c0_11 = arith.constant 0 : index
    %c0_12 = arith.constant 0 : index
    %19 = vector.load %arg5[%c0_11, %c0_12] : memref<1x128xf32, #tpu.memory_space<vmem>>, vector<1x128xf32>
    %20 = vector.broadcast %19 : vector<1x128xf32> to vector<16x128xf32>
    %21 = arith.addf %18, %20 : vector<16x128xf32>
    %cst_13 = arith.constant 5.000000e-01 : f32
    %22 = vector.broadcast %cst_13 : f32 to vector<16x128xf32>
    %23 = arith.mulf %22, %21 : vector<16x128xf32>
    %cst_14 = arith.constant 0.707106769 : f32
    %24 = vector.broadcast %cst_14 : f32 to vector<16x128xf32>
    %25 = arith.mulf %21, %24 : vector<16x128xf32>
    %26 = math.erf %25 : vector<16x128xf32>
    %cst_15 = arith.constant 1.000000e+00 : f32
    %27 = vector.broadcast %cst_15 : f32 to vector<16x128xf32>
    %28 = arith.addf %27, %26 : vector<16x128xf32>
    %29 = arith.mulf %23, %28 : vector<16x128xf32>
    %30 = arith.addf %15, %29 : vector<16x128xf32>
    %31 = arith.truncf %30 : vector<16x128xf32> to vector<16x128xbf16>
    %c0_16 = arith.constant 0 : index
    %c0_17 = arith.constant 0 : index
    %32 = vector.load %arg6[%c0_16, %c0_17] : memref<128x128xbf16, #tpu.memory_space<vmem>>, vector<128x128xbf16>
    %cst_18 = arith.constant dense<0.000000e+00> : vector<16x128xf32>
    %33 = tpu.matmul %31, %32, %cst_18 {dimension_numbers = #tpu.dot_dimension_numbers<[1], [0], [0], [1], [0, 0, 1, 1], [], []>} : vector<16x128xbf16>, vector<128x128xbf16>, vector<16x128xf32> -> vector<16x128xf32>
    %c0_19 = arith.constant 0 : index
    %c0_20 = arith.constant 0 : index
    %34 = vector.load %arg7[%c0_19, %c0_20] : memref<1x128xf32, #tpu.memory_space<vmem>>, vector<1x128xf32>
    %35 = vector.broadcast %34 : vector<1x128xf32> to vector<16x128xf32>
    %36 = arith.addf %33, %35 : vector<16x128xf32>
    %cst_21 = arith.constant 5.000000e-01 : f32
    %37 = vector.broadcast %cst_21 : f32 to vector<16x128xf32>
    %38 = arith.mulf %37, %36 : vector<16x128xf32>
    %cst_22 = arith.constant 0.707106769 : f32
    %39 = vector.broadcast %cst_22 : f32 to vector<16x128xf32>
    %40 = arith.mulf %36, %39 : vector<16x128xf32>
    %41 = math.erf %40 : vector<16x128xf32>
    %cst_23 = arith.constant 1.000000e+00 : f32
    %42 = vector.broadcast %cst_23 : f32 to vector<16x128xf32>
    %43 = arith.addf %42, %41 : vector<16x128xf32>
    %44 = arith.mulf %38, %43 : vector<16x128xf32>
    %45 = arith.truncf %44 : vector<16x128xf32> to vector<16x128xbf16>
    %c0_24 = arith.constant 0 : index
    %c0_25 = arith.constant 0 : index
    %46 = vector.load %arg8[%c0_24, %c0_25] : memref<16x128xbf16, #tpu.memory_space<vmem>>, vector<16x128xbf16>
    tpu.vector_store %arg8[%c0_24, %c0_25], %45 {strides = array<i32>} : memref<16x128xbf16, #tpu.memory_space<vmem>>, vector<16x128xbf16>,
    return
  }
  func.func @transform_0(%arg0: i32) -> (i32, i32) {
    %c0_i32 = arith.constant 0 : i32
    %c0_i32_0 = arith.constant 0 : i32
    return %arg0, %c0_i32 : i32, i32
  }
  func.func @transform_1(%arg0: i32) -> (i32, i32) {
    %c0_i32 = arith.constant 0 : i32
    %c0_i32_0 = arith.constant 0 : i32
    %c0_i32_1 = arith.constant 0 : i32
    return %c0_i32, %c0_i32_0 : i32, i32
  }
  func.func @transform_2(%arg0: i32) -> (i32, i32) {
    %c0_i32 = arith.constant 0 : i32
    %c0_i32_0 = arith.constant 0 : i32
    %c0_i32_1 = arith.constant 0 : i32
    return %c0_i32, %c0_i32_0 : i32, i32
  }
  func.func @transform_3(%arg0: i32) -> (i32, i32) {
    %c0_i32 = arith.constant 0 : i32
    %c0_i32_0 = arith.constant 0 : i32
    %c0_i32_1 = arith.constant 0 : i32
    return %c0_i32, %c0_i32_0 : i32, i32
  }
  func.func @transform_4(%arg0: i32) -> (i32, i32) {
    %c0_i32 = arith.constant 0 : i32
    %c0_i32_0 = arith.constant 0 : i32
    %c0_i32_1 = arith.constant 0 : i32
    return %c0_i32, %c0_i32_0 : i32, i32
  }
  func.func @transform_5(%arg0: i32) -> (i32, i32) {
    %c0_i32 = arith.constant 0 : i32
    %c0_i32_0 = arith.constant 0 : i32
    %c0_i32_1 = arith.constant 0 : i32
    return %c0_i32, %c0_i32_0 : i32, i32
  }
  func.func @transform_6(%arg0: i32) -> (i32, i32) {
    %c0_i32 = arith.constant 0 : i32
    %c0_i32_0 = arith.constant 0 : i32
    %c0_i32_1 = arith.constant 0 : i32
    return %c0_i32, %c0_i32_0 : i32, i32
  }
  func.func @transform_7(%arg0: i32) -> (i32, i32) {
    %c0_i32 = arith.constant 0 : i32
    %c0_i32_0 = arith.constant 0 : i32
    return %arg0, %c0_i32 : i32, i32
  }
}

</mosaic_0001>

<bundles_post_ra>
// kernel: tpu_custom_call.1
= control target key start
LH: loop header
LB: loop body
LE: loop exit
PB: predicated region body
PF: predicated region fallthrough
CT: control target
= control target key end

     0   :  { %s1918_s0 = inlined_call_operand.hbm [shape: bf16[48,128], index: 0, kind: input, shape index: {}]   ;;  %s1919_s1 = inlined_call_operand.hbm [shape: bf16[128,256], index: 1, kind: input, shape index: {}]   ;;  %s1920_s2 = inlined_call_operand.hbm [shape: f32[1,256], index: 2, kind: input, shape index: {}]   ;;  %s1921_s3 = inlined_call_operand.hbm [shape: bf16[128,128], index: 3, kind: input, shape index: {}]   ;;  %s1922_s4 = inlined_call_operand.vmem [shape: f32[1,128], index: 4, kind: input, shape index: {}]   ;;  %s1923_s5 = inlined_call_operand.hbm [shape: bf16[128,128], index: 5, kind: input, shape index: {}]   ;;  %s1924_s6 = inlined_call_operand.vmem [shape: f32[1,128], index: 6, kind: input, shape index: {}]   ;;  %s1925_s7 = inlined_call_operand.hbm [shape: bf16[48,128], index: 7, kind: output, shape index: {}]  }
   0x1   :  { %1928 = sst [smem:[#allocation16_spill]] %s1919_s1 }
   0x2   :  { %12 = vsyncpa [#allocation3], 0 }
   0x3   :  { %14 = vsyncpa [#allocation3 + $0x1], 0 }
   0x4   :  { %15 = vsyncpa [#allocation6], 0 }
   0x5   :  { %16 = vsyncpa [#allocation9], 0 }
   0x6   :  { %17 = vsyncpa [#allocation4], 0 }
   0x7   :  { %19 = vsyncpa [#allocation4 + $0x1], 0  ;;  %s1649_s24 = smov 0   ;;  %s1651_s25 = smov 0  }
   0x8   :  { %s1653_s26 = smov 0   ;;  %s1655_s27 = smov 0  }
   0x9 LB: > { %s1670_s28 = sadd.s32 4294967295, %s1597_s27   ;;  %s1066_s29 = sadd.s32 4294967294, %s1597_s27   ;;  %s1597_s27 = sphi %s1655_s27, %s1941_s27   ;;  %s1593_s26 = sphi %s1653_s26, %s1940_s26   ;;  %s1589_s25 = sphi %s1651_s25, %s1939_s25   ;;  %s1585_s24 = sphi %s1649_s24, %s1938_s24  }
   0xa   : > { %p45_p0 = scmp.ne.s32.totalorder %s1589_s25, %s1585_s24  ;;  %p46_p1 = scmp.eq.s32.totalorder %s1670_s28, 0 }
   0xb   : > { %p195_p2 = scmp.eq.s32.totalorder %s1670_s28, 2  ;;  %p201_p3 = scmp.eq.s32.totalorder %s1066_s29, 2 }
   0xc   : > { %p1679_p4 = por %p46_p1, %p45_p0  ;;  %p1067_p5 = scmp.ge.s32.totalorder %s1597_s27, 1 }
   0xd   : > { %p1684_p6 = por %p201_p3, %p45_p0  ;;  %p208_p7 = scmp.lt.s32.totalorder %s1597_s27, 4 }
   0xe   : > { %s1931_s1 = sld [smem:[#allocation16_spill]]  ;;  %s1599_s13 = smov [#allocation5]  }
   0xf   : > { %p1692_p8 = pnand %p1067_p5, %p208_p7  ;;  %s221_s14 = sshll.u32 %s1599_s13, 4  ;;  %s222_s14 = int_to_ptr.vmem [resolvable:$true] %s221_s14 }
  0x10   : > { %s245_s18 = sshll.u32 %s1921_s3, 4  ;;  %s1600_s19 = smov 128   ;;  %s246_s18 = int_to_ptr.hbm [resolvable:$true] %s245_s18 }
  0x11   : > { %p1286_p9 = pneg %p1692_p8  ;;  %s1601_s20 = smov 8  }
  0x12   : > { %s1602_s21 = smov [#allocation8]   ;;  %s1926_s23 = smov 64  }
  0x13   : > { %p1700_p10 = pnand %p1286_p9, %p46_p1  ;;  %s247_s22 = sshll.u32 %s1602_s21, 4  ;;  %s248_s22 = int_to_ptr.vmem [resolvable:$true] %s247_s22 }
  0x14   : > { %s219_s11 = sshll.u32 %s1931_s1, 4  ;;  %s1927_s29 = smov 4   ;;  %s220_s11 = int_to_ptr.hbm [resolvable:$true] %s219_s11 }
  0x15   : > { %1289 = dma.hbm_to_vmem [thread:$0]  (!%p1700_p10), %s220_s11, 2048, %s222_s14, [#allocation6], %s1600_s19, %s1600_s19, %s1601_s20  }
  0x16   : > { %1295 = dma.hbm_to_vmem [thread:$0]  (!%p1700_p10), %s246_s18, 1024, %s248_s22, [#allocation9], %s1926_s23, %s1926_s23, %s1927_s29  }
  0x17   : > { %s234_s11 = sshll.u32 %s1920_s2, 4  ;;  %s1605_s13 = smov [#allocation7]   ;;  %s235_s11 = int_to_ptr.hbm [resolvable:$true] %s234_s11 }
  0x18   : > { %s236_s14 = sshll.u32 %s1605_s13, 4  ;;  %s262_s19 = sshll.u32 %s1923_s5, 4  ;;  %s237_s14 = int_to_ptr.vmem [resolvable:$true] %s236_s14  ;;  %s263_s19 = int_to_ptr.hbm [resolvable:$true] %s262_s19 }
  0x19   : > { %1292 = dma.hbm_to_vmem [thread:$0]  (!%p1700_p10), %s235_s11, 32, %s237_s14, [#allocation6]  }
  0x1a   : > { %s1606_s18 = smov [#allocation10]   ;;  %s1728_s21 = sadd.s32 1, %s1597_s27  }
  0x1b   : > { %s264_s20 = sshll.u32 %s1606_s18, 4  ;;  %s32_s22 = sadd.s32 1, %s1593_s26  ;;  %s265_s20 = int_to_ptr.vmem [resolvable:$true] %s264_s20 }
  0x1c   : > { %1298 = dma.hbm_to_vmem [thread:$0]  (!%p1700_p10), %s263_s19, 1024, %s265_s20, [#allocation9], %s1926_s23, %s1926_s23, %s1927_s29  }
  0x1d   : > { %s29_s9 = ssub.s32 %s1597_s27, %s1728_s21  ;;  %p39_p11 = scmp.ne.s32.totalorder %s1593_s26, %s1589_s25 }
  0x1e   : > { %p30_p12 = scmp.eq.s32.totalorder %s29_s9, 0  ;;  %p40_p13 = scmp.eq.s32.totalorder %s1597_s27, 0 }
  0x1f   : > { %p1738_p0 = por %p195_p2, %p39_p11  ;;  %p1311_p3 = scmp.lt.s32.totalorder %s1597_s27, 3 }
  0x20   : > { %s1744_s11 = scalar_select %p30_p12, %s1593_s26, %s32_s22  }
  0x21   : > { %p41_p5 = por %p40_p13, %p39_p11  ;;  %s281_s15 = sand.u32 1, %s1593_s26  }
  0x22   : > { %s1073_s13 = sshll.u32 %s281_s15, 3  ;;  %s1226_s14 = sshll.u32 %s1597_s27, 3 }
  0x23   : > { %s290_s19 = scalar_lea.hbm %s1918_s0, %s1226_s14  ;;  %s285_s18 = scalar_lea.vmem [#allocation2], %s1073_s13 }
  0x24   : > { %s293_s20 = sshll.u32 %s285_s18, 4  ;;  %s291_s9 = sshll.u32 %s290_s19, 4  ;;  %s294_s20 = int_to_ptr.vmem [resolvable:$true] %s293_s20  ;;  %s292_s9 = int_to_ptr.hbm [resolvable:$true] %s291_s9 }
  0x25   : > { %p1751_p2 = pnand %p1311_p3, %p41_p5  ;;  %s282_s22 = scalar_lea.sflag [#allocation3], %s281_s15 }
  0x26   : > { %s1493_s29 = sshra.s32 %s292_s9, 4  ;;  %s1500_s16 = scalar_lea.hbm %s1918_s0, 24  ;;  %s1494_s29 = int_to_ptr.hbm [resolvable:$true] %s1493_s29 }
  0x27   : > { %s1495_s1 = scalar_lea.hbm %s1494_s29, 8  ;;  %p1497_p9 = pneg %p1751_p2 }
  0x28   : > { %p1496_p7 = scmp.ne.s32.totalorder %s1494_s29, %s1495_s1  ;;  %p1501_p12 = scmp.lt.s32.totalorder %s1494_s29, %s1918_s0 }
  0x29   : > { %p1502_p13 = scmp.lt.s32.totalorder %s1500_s16, %s1495_s1 }
  0x2a   : > { %p1498_p10 = pnand %p1497_p9, %p1496_p7 }
  0x2b   : > { %p1503_p3 = por %p1502_p13, %p1501_p12 }
  0x2c   : > { %p1499_p11 = pneg %p1498_p10 }
  0x2e   : > { %p1504_p5 = pnand %p1503_p3, %p1499_p11 }
  0x30   : > { %1507 = shalt.err (!%p1504_p5)
}
  0x31   : > { %s1936_s15 = smov 4   ;;  %s1937_s18 = smov 64  }
  0x32   : > { %1302 = dma.hbm_to_vmem [thread:$0]  (!%p1751_p2), %s292_s9, 128, %s294_s20, %s282_s22, %s1937_s18, %s1937_s18, %s1936_s15  }
  0x33   : > { %305 = sbr.rel (%p1692_p8) target bundleno = 680 (0x2a8), region = 48  ;;  %s1771_s14 = sand.u32 (!%p1692_p8), 1, %s1589_s25  }
  0x34   : > { %s1077_s1 = sshll.u32 (!%p1692_p8), %s1771_s14, 3  ;;  %s308_s29 = scalar_lea.sflag (!%p1692_p8), [#allocation3], %s1771_s14 }
  0x35   : > { %s1777_s13 = scalar_lea.vmem (!%p1692_p8), [#allocation2], %s1077_s1 }
  0x38   : > { %1568 = dma.done.wait (%p1679_p4), %s308_s29, 128  }
  0x39   : > { %1570 = vsyncadd (%p1679_p4), %s308_s29, 4294967168 }
  0x3a   : > { %1572 = dma.done.wait (%p46_p1), [#allocation6], 2080  }
  0x3b   : > { %1574 = vsyncadd (%p46_p1), [#allocation6], 4294965216 }
  0x3c   : > { %1576 = dma.done.wait (%p46_p1), [#allocation9], 2048  }
  0x3d   : > { %1578 = vsyncadd (%p46_p1), [#allocation9], 4294965248  ;;  %v1145_v0 = vld [vmem:[#allocation5 + $0x70] sm:$0xf]  ;;  %v1243_v1 = vld [vmem:[#allocation5 + $0x74] sm:$0xf0] }
  0x3e   : > { %v1137_v2 = vld [vmem:[#allocation5 + $0x60] sm:$0xf]  ;;  %v1146_v3 = vor.u32 %v1243_v1, %v1145_v0  ;;  %v1241_v4 = vld [vmem:[#allocation5 + $0x64] sm:$0xf0]  ;;  %v1129_v6 = vld [vmem:[#allocation5 + $0x50] sm:$0xf] }
  0x3f   : > { %v1138_v5 = vor.u32 %v1241_v4, %v1137_v2  ;;  %v1239_v7 = vld [vmem:[#allocation5 + $0x54] sm:$0xf0]  ;;  %v1121_v9 = vld [vmem:[#allocation5 + $0x40] sm:$0xf]  ;;  %v1237_v10 = vld [vmem:[#allocation5 + $0x44] sm:$0xf0] }
  0x40   : > { %475 = vmatpush.bf16.msra.mxu0 %v1146_v3  ;;  %v1130_v8 = vor.u32 %v1239_v7, %v1129_v6  ;;  %v1122_v11 = vor.u32 %v1237_v10, %v1121_v9  ;;  %v1113_v12 = vld [vmem:[#allocation5 + $0x30] sm:$0xf]  ;;  %v1235_v13 = vld [vmem:[#allocation5 + $0x34] sm:$0xf0]  ;;  %v1105_v15 = vld [vmem:[#allocation5 + $0x20] sm:$0xf] }
  0x41   : > { %v1114_v14 = vor.u32 %v1235_v13, %v1113_v12  ;;  %v1233_v16 = vld [vmem:[#allocation5 + $0x24] sm:$0xf0]  ;;  %v1097_v18 = vld [vmem:[#allocation5 + $0x10] sm:$0xf]  ;;  %v1231_v19 = vld [vmem:[#allocation5 + $0x14] sm:$0xf0] }
  0x42   : > { %v1106_v17 = vor.u32 %v1233_v16, %v1105_v15  ;;  %v1098_v20 = vor.u32 %v1231_v19, %v1097_v18  ;;  %v1089_v21 = vld [vmem:[#allocation5] sm:$0xf]  ;;  %v1229_v22 = vld [vmem:[#allocation5 + $0x4] sm:$0xf0]  ;;  %v1792_v24 = vld [vmem:[%s1777_s13] sm:$0xff]  ;;  %s1260_s9 = sshll.u32 %s1670_s28, 3 }
  0x43   : > { %v1090_v23 = vor.u32 %v1229_v22, %v1089_v21  ;;  %v1795_v25 = vld [vmem:[#allocation7] sm:$0x3]  ;;  %v1250_v31 = vld [vmem:[#allocation8 + $0x30] sm:$0xff]  ;;  %v1249_v33 = vld [vmem:[#allocation8 + $0x28] sm:$0xff]  ;;  %s951_s17 = scalar_lea.hbm %s1925_s7, %s1260_s9  ;;  %s362_s19 = scalar_lea.vmem [#allocation11], %s1077_s1 }
  0x44   : > { %476 = vmatpush.bf16.msra.mxu0 %v1138_v5  ;;  %v385_v26 = vperm.slane %v1795_v25, 0  ;;  %v1251_v27 = vld [vmem:[#allocation8 + $0x38] sm:$0xff]  ;;  %v1248_v38 = vld [vmem:[#allocation8 + $0x20] sm:$0xff]  ;;  %v1246_v50 = vld [vmem:[#allocation8 + $0x10] sm:$0xff]  ;;  %s952_s15 = sshll.u32 %s362_s19, 4  ;;  %s954_s18 = sshll.u32 %s951_s17, 4  ;;  %s953_s15 = int_to_ptr.vmem [resolvable:$true] %s952_s15  ;;  %s955_s18 = int_to_ptr.hbm [resolvable:$true] %s954_s18 }
  0x45   : > { %660 = vmatpush.bf16.msra.mxu2 %v1251_v27  ;;  %v1247_v44 = vld [vmem:[#allocation8 + $0x18] sm:$0xff]  ;;  %v1245_v58 = vld [vmem:[#allocation8 + $0x8] sm:$0xff]  ;;  %v1244_v1 = vld [vmem:[#allocation8] sm:$0xff]  ;;  %s940_s28 = scalar_lea.sflag [#allocation4], %s1771_s14  ;;  %s1537_s29 = sshra.s32 %s955_s18, 4  ;;  %s1538_s29 = int_to_ptr.hbm [resolvable:$true] %s1537_s29 }
  0x46   : > { %v1242_v12 = vld [vmem:[#allocation5 + $0x74] sm:$0xf]  ;;  %v1147_v13 = vld [vmem:[#allocation5 + $0x78] sm:$0xf0]  ;;  %v1240_v16 = vld [vmem:[#allocation5 + $0x64] sm:$0xf]  ;;  %p1544_p2 = scmp.lt.s32.totalorder %s1538_s29, %s1925_s7 }
  0x47   : > { %v1150_v15 = vor.u32 %v1242_v12, %v1147_v13  ;;  %s1539_s13 = scalar_lea.hbm %s1538_s29, 8  ;;  %s1543_s1 = scalar_lea.hbm %s1925_s7, 24 }
  0x48   : > { %477 = vmatpush.bf16.msra.mxu0 %v1130_v8  ;;  %p1540_p1 = scmp.ne.s32.totalorder %s1538_s29, %s1539_s13  ;;  %p1545_p7 = scmp.lt.s32.totalorder %s1543_s1, %s1539_s13 }
  0x49   : > { %661 = vmatpush.bf16.msra.mxu2 %v1250_v31  ;;  %489 = vmatpush.bf16.msra.mxu1 %v1150_v15 }
  0x4a   : > { %p1541_p4 = pnand %p1540_p1, %p1738_p0  ;;  %p1546_p9 = por %p1545_p7, %p1544_p2 }
  0x4c   : > { %478 = vmatpush.bf16.msra.mxu0 %v1122_v11  ;;  %p1542_p8 = pneg %p1541_p4 }
  0x4d   : > { %662 = vmatpush.bf16.msra.mxu2 %v1249_v33 }
  0x4e   : > { %p1547_p10 = pnand %p1546_p9, %p1542_p8 }
  0x50   : > { %479 = vmatpush.bf16.msra.mxu0 %v1114_v14 }
  0x51   : > { %663 = vmatpush.bf16.msra.mxu2 %v1248_v38  ;;  %v1123_v38 = vld [vmem:[#allocation5 + $0x48] sm:$0xf0] }
  0x54   : > { %480 = vmatpush.bf16.msra.mxu0 %v1106_v17  ;;  %v1139_v17 = vld [vmem:[#allocation5 + $0x68] sm:$0xf0] }
  0x55   : > { %664 = vmatpush.bf16.msra.mxu2 %v1247_v44  ;;  %v1142_v21 = vor.u32 %v1240_v16, %v1139_v17 }
  0x57   : > { %490 = vmatpush.bf16.msra.mxu1 %v1142_v21 }
  0x58   : > { %481 = vmatpush.bf16.msra.mxu0 %v1098_v20 }
  0x59   : > { %665 = vmatpush.bf16.msra.mxu2 %v1246_v50  ;;  %v1115_v50 = vld [vmem:[#allocation5 + $0x38] sm:$0xf0] }
  0x5c   : > { %482 = vmatpush.bf16.msra.mxu0 %v1090_v23  ;;  %v1238_v23 = vld [vmem:[#allocation5 + $0x54] sm:$0xf] }
  0x5d   : > { %666 = vmatpush.bf16.msra.mxu2 %v1245_v58 }
  0x5f   : > { %483 = vmatmul.bf16.vlgmr.msra.gmra.mxu0 %v1792_v24 }
  0x61   : > { %667 = vmatpush.bf16.msra.mxu2 %v1244_v1 }
  0xdc   : > { %v484_v28 = vpop.f32.mrf.mxu0 }
  0xdd   : > { %v1798_v29 = vadd.f32 %v484_v28, %v385_v26 }
  0xdf   : > { %v1801_v30 = vmul.f32 0.70710677, %v1798_v29  ;;  %v503_v12 = vmul.f32 0.5, %v1798_v29 }
  0xe1   : > { %v507_v32 = vmul.f32 %v1801_v30, %v1801_v30 }
  0xe3   : > { %v1805_v34 = vmin.f32 %v507_v32, 16.0 }
  0xe4   : > { %v486_v35 = vpop.f32.mrf.mxu0 }
  0xe5   : > { %v509_v36 = vmul.f32 2.1237322e-06, %v1805_v34  ;;  %v1808_v37 = vadd.f32 %v486_v35, %v385_v26  ;;  %v520_v39 = vmul.f32 3.8918573e-05, %v1805_v34  ;;  %v1131_v26 = vld [vmem:[#allocation5 + $0x58] sm:$0xf0] }
  0xe6   : > { %v1134_v33 = vor.u32 %v1238_v23, %v1131_v26  ;;  %v1258_v23 = vld [vmem:[#allocation10 + $0x30] sm:$0xff] }
  0xe7   : > { %v510_v40 = vadd.f32 0.00028619796, %v509_v36  ;;  %v1812_v41 = vmul.f32 0.70710677, %v1808_v37  ;;  %v521_v42 = vadd.f32 0.001143296, %v520_v39 }
  0xe8   : > { %v1236_v36 = vld [vmem:[#allocation5 + $0x44] sm:$0xf]  ;;  %491 = vmatpush.bf16.msra.mxu1 %v1134_v33  ;;  %v504_v13 = vmul.f32 0.5, %v1808_v37  ;;  %v1259_v37 = vld [vmem:[#allocation10 + $0x38] sm:$0xff]  ;;  %v1257_v33 = vld [vmem:[#allocation10 + $0x28] sm:$0xff] }
  0xe9   : > { %v547_v43 = vmul.f32 %v1812_v41, %v1812_v41  ;;  %v511_v45 = vmul.f32 %v510_v40, %v1805_v34  ;;  %v522_v46 = vmul.f32 %v521_v42, %v1805_v34  ;;  %833 = vmatpush.bf16.msra.mxu3 %v1259_v37 }
  0xeb   : > { %v1818_v47 = vmin.f32 %v547_v43, 16.0  ;;  %v523_v48 = vadd.f32 0.014752088, %v522_v46  ;;  %v512_v52 = vadd.f32 0.0036580483, %v511_v45  ;;  %v1126_v46 = vor.u32 %v1236_v36, %v1123_v38 }
  0xed   : > { %v549_v49 = vmul.f32 2.1237322e-06, %v1818_v47  ;;  %v560_v51 = vmul.f32 3.8918573e-05, %v1818_v47  ;;  %v524_v53 = vmul.f32 %v523_v48, %v1805_v34  ;;  %v513_v60 = vmul.f32 %v512_v52, %v1805_v34  ;;  %492 = vmatpush.bf16.msra.mxu1 %v1126_v46  ;;  %834 = vmatpush.bf16.msra.mxu3 %v1258_v23 }
  0xef   : > { %v550_v54 = vadd.f32 0.00028619796, %v549_v49  ;;  %v561_v55 = vadd.f32 0.001143296, %v560_v51  ;;  %v525_v56 = vadd.f32 0.112945676, %v524_v53 }
  0xf0   : > { %v514_v3 = vadd.f32 0.05243302, %v513_v60  ;;  %v1234_v49 = vld [vmem:[#allocation5 + $0x34] sm:$0xf]  ;;  %v1232_v60 = vld [vmem:[#allocation5 + $0x24] sm:$0xf] }
  0xf1   : > { %v551_v57 = vmul.f32 %v550_v54, %v1818_v47  ;;  %v562_v59 = vmul.f32 %v561_v55, %v1818_v47  ;;  %v526_v61 = vmul.f32 %v525_v56, %v1805_v34  ;;  %835 = vmatpush.bf16.msra.mxu3 %v1257_v33 }
  0xf2   : > { %v515_v9 = vmul.f32 %v514_v3, %v1805_v34  ;;  %v1230_v3 = vld [vmem:[#allocation5 + $0x14] sm:$0xf] }
  0xf3   : > { %v552_v62 = vadd.f32 0.0036580483, %v551_v57  ;;  %v563_v63 = vadd.f32 0.014752088, %v562_v59  ;;  %v527_v0 = vadd.f32 0.4994258, %v526_v61  ;;  %v1118_v57 = vor.u32 %v1234_v49, %v1115_v50 }
  0xf4   : > { %v516_v18 = vadd.f32 0.18741608, %v515_v9  ;;  %v1107_v61 = vld [vmem:[#allocation5 + $0x28] sm:$0xf0]  ;;  %v1255_v49 = vld [vmem:[#allocation10 + $0x18] sm:$0xff] }
  0xf5   : > { %v564_v2 = vmul.f32 %v563_v63, %v1818_v47  ;;  %v528_v4 = vmul.f32 %v527_v0, %v1805_v34  ;;  %v553_v5 = vmul.f32 %v552_v62, %v1818_v47  ;;  %493 = vmatpush.bf16.msra.mxu1 %v1118_v57  ;;  %v1110_v0 = vor.u32 %v1232_v60, %v1107_v61  ;;  %v1254_v57 = vld [vmem:[#allocation10 + $0x10] sm:$0xff] }
  0xf6   : > { %v517_v28 = vmul.f32 %v516_v18, %v1805_v34  ;;  %v1359_v18 = vld [vmem:[%s1922_s4] ss:$0 sm:$0xff] }
  0xf7   : > { %v565_v6 = vadd.f32 0.112945676, %v564_v2  ;;  %v529_v7 = vadd.f32 1.0, %v528_v4  ;;  %v554_v10 = vadd.f32 0.05243302, %v553_v5 }
  0xf8   : > { %v518_v42 = vadd.f32 1.1283791, %v517_v28  ;;  %v1099_v4 = vld [vmem:[#allocation5 + $0x18] sm:$0xf0] }
  0xf9   : > { %v566_v8 = vmul.f32 %v565_v6, %v1818_v47  ;;  %1361 = vrcp.f32 %v529_v7  ;;  %v555_v19 = vmul.f32 %v554_v10, %v1818_v47  ;;  %v541_v35 = vand.u32 2147483648, %v529_v7  ;;  %494 = vmatpush.bf16.msra.mxu1 %v1110_v0  ;;  %v1228_v10 = vld [vmem:[#allocation5 + $0x4] sm:$0xf] }
  0xfa   : > { %v539_v40 = vand.u32 2147483647, %v529_v7  ;;  %vm535_vm1 = vweird.f32 %v529_v7  ;;  %v519_v52 = vmul.f32 %v518_v42, %v1801_v30  ;;  %v1256_v42 = vld [vmem:[#allocation10 + $0x20] sm:$0xff] }
  0xfb   : > { %v567_v11 = vadd.f32 0.4994258, %v566_v8  ;;  %v556_v31 = vadd.f32 0.18741608, %v555_v19  ;;  %v542_v34 = vor.u32 1.1754944e-38, %v541_v35  ;;  %836 = vmatpush.bf16.msra.mxu3 %v1256_v42 }
  0xfc   : > { %vm540_vm3 = vcmp.eq.f32.partialorder %v539_v40, 8.507059e+37 }
  0xfd   : > { %v568_v14 = vmul.f32 %v567_v11, %v1818_v47  ;;  %v557_v44 = vmul.f32 %v556_v31, %v1818_v47  ;;  %v1091_v11 = vld [vmem:[#allocation5 + $0x8] sm:$0xf0] }
  0xff   : > { %v569_v20 = vadd.f32 1.0, %v568_v14  ;;  %v1362_v22 = vpop.eup %1361  ;;  %v558_v55 = vadd.f32 1.1283791, %v557_v44  ;;  %837 = vmatpush.bf16.msra.mxu3 %v1255_v49 }
 0x100   : > { %v531_v27 = vmul.f32 %v1362_v22, %v529_v7  ;;  %vm536_vm0 = vweird.f32 %v1362_v22  ;;  %v1102_v7 = vor.u32 %v1230_v3, %v1099_v4  ;;  %v1252_v3 = vld [vmem:[#allocation10] sm:$0xff] }
 0x101   : > { %1363 = vrcp.f32 %v569_v20  ;;  %vm537_vm2 = vmor %vm535_vm1, %vm536_vm0  ;;  %v581_v56 = vand.u32 2147483648, %v569_v20  ;;  %v579_v59 = vand.u32 2147483647, %v569_v20  ;;  %vm575_vm5 = vweird.f32 %v569_v20 }
 0x102   : > { %v532_v32 = vsub.f32 1.0, %v531_v27  ;;  %v559_v30 = vmul.f32 %v558_v55, %v1812_v41  ;;  %495 = vmatpush.bf16.msra.mxu1 %v1102_v7  ;;  %v1094_v41 = vor.u32 %v1228_v10, %v1091_v11 }
 0x103   : > { %v582_v63 = vor.u32 1.1754944e-38, %v581_v56  ;;  %vm580_vm7 = vcmp.eq.f32.partialorder %v579_v59, 8.507059e+37  ;;  %838 = vmatpush.bf16.msra.mxu3 %v1254_v57 }
 0x104   : > { %v533_v39 = vmul.f32 %v1362_v22, %v532_v32 }
 0x106   : > { %v534_v45 = vadd.f32 %v1362_v22, %v533_v39  ;;  %496 = vmatpush.bf16.msra.mxu1 %v1094_v41 }
 0x107   : > { %v1364_v43 = vpop.eup %1363 }
 0x108   : > { %v571_v48 = vmul.f32 %v1364_v43, %v569_v20  ;;  %v538_v51 = vsel %vm537_vm2, %v1362_v22, %v534_v45  ;;  %vm576_vm4 = vweird.f32 %v1364_v43 }
 0x109   : > { %v543_v53 = vsel %vm540_vm3, %v542_v34, %v538_v51  ;;  %vm577_vm6 = vmor %vm575_vm5, %vm576_vm4  ;;  %497 = vmatmul.bf16.vlgmr.msra.gmra.mxu1 %v1792_v24 }
 0x10a   : > { %v572_v54 = vsub.f32 1.0, %v571_v48  ;;  %v544_v47 = vmul.f32 %v543_v53, %v519_v52 }
 0x10c   : > { %v573_v58 = vmul.f32 %v1364_v43, %v572_v54  ;;  %v1151_v1 = vclamps-f32 %v544_v47, 1.0 }
 0x10e   : > { %v574_v62 = vadd.f32 %v1364_v43, %v573_v58  ;;  %v587_v9 = vadd.f32 1.0, %v1151_v1 }
 0x110   : > { %v578_v2 = vsel %vm577_vm6, %v1364_v43, %v574_v62  ;;  %v589_v15 = vmul.f32 %v587_v9, %v503_v12 }
 0x111   : > { %v583_v5 = vsel %vm580_vm7, %v582_v63, %v578_v2  ;;  %v1253_v63 = vld [vmem:[#allocation10 + $0x8] sm:$0xff] }
 0x112   : > { %v584_v6 = vmul.f32 %v583_v5, %v559_v30  ;;  %839 = vmatpush.bf16.msra.mxu3 %v1253_v63 }
 0x114   : > { %v1152_v8 = vclamps-f32 %v584_v6, 1.0 }
 0x116   : > { %v588_v14 = vadd.f32 1.0, %v1152_v8  ;;  %840 = vmatpush.bf16.msra.mxu3 %v1252_v3 }
 0x118   : > { %v590_v16 = vmul.f32 %v588_v14, %v504_v13 }
 0x11a   : > { %v591_v17 = vpack.c.bf16 %v590_v16, %v589_v15 }
 0x11c   : > { %668 = vmatmul.bf16.vlgmr.msra.gmra.mxu2 %v591_v17 }
 0x186   : > { %v498_v33 = vpop.f32.mrf.mxu1 }
 0x19f   : > { %v669_v19 = vpop.f32.mrf.mxu2 }
 0x1a0   : > { %v1844_v20 = vadd.f32 %v1359_v18, %v669_v19 }
 0x1a2   : > { %v1847_v29 = vmul.f32 0.70710677, %v1844_v20  ;;  %v674_v49 = vmul.f32 0.5, %v1844_v20 }
 0x1a4   : > { %v678_v21 = vmul.f32 %v1847_v29, %v1847_v29 }
 0x1a6   : > { %v679_v22 = vmin.f32 %v678_v21, 16.0 }
 0x1a7   : > { %v671_v26 = vpop.f32.mrf.mxu2 }
 0x1a8   : > { %v680_v27 = vmul.f32 2.1237322e-06, %v679_v22  ;;  %v691_v24 = vmul.f32 3.8918573e-05, %v679_v22  ;;  %v1851_v28 = vadd.f32 %v1359_v18, %v671_v26 }
 0x1aa   : > { %v681_v31 = vadd.f32 0.00028619796, %v680_v27  ;;  %v692_v32 = vadd.f32 0.001143296, %v691_v24  ;;  %v1854_v35 = vmul.f32 0.70710677, %v1851_v28 }
 0x1ac   : > { %v682_v36 = vmul.f32 %v681_v31, %v679_v22  ;;  %v693_v38 = vmul.f32 %v692_v32, %v679_v22  ;;  %v718_v39 = vmul.f32 %v1854_v35, %v1854_v35 }
 0x1ae   : > { %v694_v40 = vadd.f32 0.014752088, %v693_v38  ;;  %v719_v43 = vmin.f32 %v718_v39, 16.0  ;;  %v683_v44 = vadd.f32 0.0036580483, %v682_v36 }
 0x1b0   : > { %v695_v45 = vmul.f32 %v694_v40, %v679_v22  ;;  %v720_v46 = vmul.f32 2.1237322e-06, %v719_v43  ;;  %v731_v34 = vmul.f32 3.8918573e-05, %v719_v43  ;;  %v684_v52 = vmul.f32 %v683_v44, %v679_v22 }
 0x1b2   : > { %v696_v48 = vadd.f32 0.112945676, %v695_v45  ;;  %v721_v50 = vadd.f32 0.00028619796, %v720_v46  ;;  %v732_v51 = vadd.f32 0.001143296, %v731_v34 }
 0x1b3   : > { %v685_v58 = vadd.f32 0.05243302, %v684_v52  ;;  %v386_v34 = vperm.slane %v1795_v25, 1  ;;  %v675_v52 = vmul.f32 0.5, %v1851_v28  ;;  %v1360_v25 = vld [vmem:[%s1924_s6] ss:$0 sm:$0xff] }
 0x1b4   : > { %v697_v53 = vmul.f32 %v696_v48, %v679_v22  ;;  %v722_v54 = vmul.f32 %v721_v50, %v719_v43  ;;  %v733_v55 = vmul.f32 %v732_v51, %v719_v43  ;;  %v500_v51 = vpop.f32.mrf.mxu1 }
 0x1b5   : > { %v686_v30 = vmul.f32 %v685_v58, %v679_v22 }
 0x1b6   : > { %v698_v56 = vadd.f32 0.4994258, %v697_v53  ;;  %v734_v47 = vadd.f32 0.014752088, %v733_v55  ;;  %v723_v60 = vadd.f32 0.0036580483, %v722_v54  ;;  %v499_v53 = vadd.f32 %v498_v33, %v386_v34 }
 0x1b7   : > { %v687_v5 = vadd.f32 0.18741608, %v686_v30 }
 0x1b8   : > { %v699_v59 = vmul.f32 %v698_v56, %v679_v22  ;;  %v735_v61 = vmul.f32 %v734_v47, %v719_v43  ;;  %v724_v1 = vmul.f32 %v723_v60, %v719_v43  ;;  %v501_v56 = vadd.f32 %v500_v51, %v386_v34 }
 0x1b9   : > { %v688_v11 = vmul.f32 %v687_v5, %v679_v22 }
 0x1ba   : > { %v700_v62 = vadd.f32 1.0, %v699_v59  ;;  %v736_v0 = vadd.f32 0.112945676, %v735_v61  ;;  %v725_v6 = vadd.f32 0.05243302, %v724_v1 }
 0x1bb   : > { %v689_v16 = vadd.f32 1.1283791, %v688_v11 }
 0x1bc   : > { %1365 = vrcp.f32 %v700_v62  ;;  %v737_v2 = vmul.f32 %v736_v0, %v719_v43  ;;  %v726_v12 = vmul.f32 %v725_v6, %v719_v43  ;;  %v712_v14 = vand.u32 2147483648, %v700_v62 }
 0x1bd   : > { %v710_v15 = vand.u32 2147483647, %v700_v62  ;;  %vm706_vm9 = vweird.f32 %v700_v62  ;;  %v690_v23 = vmul.f32 %v689_v16, %v1847_v29 }
 0x1be   : > { %v738_v4 = vadd.f32 0.4994258, %v737_v2  ;;  %v727_v17 = vadd.f32 0.18741608, %v726_v12  ;;  %v713_v19 = vor.u32 1.1754944e-38, %v712_v14 }
 0x1bf   : > { %vm711_vm11 = vcmp.eq.f32.partialorder %v710_v15, 8.507059e+37 }
 0x1c0   : > { %v739_v7 = vmul.f32 %v738_v4, %v719_v43  ;;  %v728_v22 = vmul.f32 %v727_v17, %v719_v43 }
 0x1c2   : > { %v1366_v8 = vpop.eup %1365  ;;  %v740_v10 = vadd.f32 1.0, %v739_v7  ;;  %v729_v36 = vadd.f32 1.1283791, %v728_v22 }
 0x1c3   : > { %v702_v9 = vmul.f32 %v1366_v8, %v700_v62  ;;  %vm707_vm8 = vweird.f32 %v1366_v8 }
 0x1c4   : > { %1367 = vrcp.f32 %v740_v10  ;;  %vm708_vm10 = vmor %vm706_vm9, %vm707_vm8  ;;  %v752_v32 = vand.u32 2147483648, %v740_v10  ;;  %v750_v39 = vand.u32 2147483647, %v740_v10  ;;  %vm746_vm13 = vweird.f32 %v740_v10 }
 0x1c5   : > { %v703_v13 = vsub.f32 1.0, %v702_v9  ;;  %v730_v45 = vmul.f32 %v729_v36, %v1854_v35 }
 0x1c6   : > { %v753_v44 = vor.u32 1.1754944e-38, %v752_v32  ;;  %vm751_vm15 = vcmp.eq.f32.partialorder %v750_v39, 8.507059e+37 }
 0x1c7   : > { %v704_v41 = vmul.f32 %v1366_v8, %v703_v13 }
 0x1c9   : > { %v705_v18 = vadd.f32 %v1366_v8, %v704_v41 }
 0x1ca   : > { %v1368_v37 = vpop.eup %1367 }
 0x1cb   : > { %v709_v21 = vsel %vm708_vm10, %v1366_v8, %v705_v18  ;;  %v742_v27 = vmul.f32 %v1368_v37, %v740_v10  ;;  %vm747_vm12 = vweird.f32 %v1368_v37 }
 0x1cc   : > { %v714_v26 = vsel %vm711_vm11, %v713_v19, %v709_v21  ;;  %vm748_vm14 = vmor %vm746_vm13, %vm747_vm12 }
 0x1cd   : > { %v715_v24 = vmul.f32 %v714_v26, %v690_v23  ;;  %v743_v31 = vsub.f32 1.0, %v742_v27 }
 0x1cf   : > { %v744_v38 = vmul.f32 %v1368_v37, %v743_v31  ;;  %v1185_v42 = vclamps-f32 %v715_v24, 1.0 }
 0x1d1   : > { %v745_v40 = vadd.f32 %v1368_v37, %v744_v38  ;;  %v758_v48 = vadd.f32 1.0, %v1185_v42 }
 0x1d3   : > { %v749_v46 = vsel %vm748_vm14, %v1368_v37, %v745_v40  ;;  %v760_v54 = vmul.f32 %v758_v48, %v674_v49 }
 0x1d4   : > { %v754_v29 = vsel %vm751_vm15, %v753_v44, %v749_v46 }
 0x1d5   : > { %v755_v43 = vmul.f32 %v754_v29, %v730_v45  ;;  %v762_v47 = vadd.f32 %v760_v54, %v499_v53 }
 0x1d7   : > { %v1186_v50 = vclamps-f32 %v755_v43, 1.0 }
 0x1d9   : > { %v759_v55 = vadd.f32 1.0, %v1186_v50 }
 0x1db   : > { %v761_v57 = vmul.f32 %v759_v55, %v675_v52 }
 0x1dd   : > { %v763_v35 = vadd.f32 %v761_v57, %v501_v56 }
 0x1df   : > { %v764_v58 = vpack.c.bf16 %v763_v35, %v762_v47 }
 0x1e1   : > { %841 = vmatmul.bf16.vlgmr.msra.gmra.mxu3 %v764_v58 }
 0x264   : > { %v842_v59 = vpop.f32.mrf.mxu3 }
 0x265   : > { %v1866_v60 = vadd.f32 %v1360_v25, %v842_v59 }
 0x267   : > { %v1869_v20 = vmul.f32 0.70710677, %v1866_v60 }
 0x269   : > { %v851_v28 = vmul.f32 %v1869_v20, %v1869_v20 }
 0x26b   : > { %v852_v61 = vmin.f32 %v851_v28, 16.0 }
 0x26c   : > { %v844_v62 = vpop.f32.mrf.mxu3 }
 0x26d   : > { %v853_v63 = vmul.f32 2.1237322e-06, %v852_v61  ;;  %v864_v0 = vmul.f32 3.8918573e-05, %v852_v61  ;;  %v1873_v30 = vadd.f32 %v1360_v25, %v844_v62 }
 0x26f   : > { %v854_v1 = vadd.f32 0.00028619796, %v853_v63  ;;  %v865_v2 = vadd.f32 0.001143296, %v864_v0  ;;  %v1876_v3 = vmul.f32 0.70710677, %v1873_v30 }
 0x271   : > { %v866_v4 = vmul.f32 %v865_v2, %v852_v61  ;;  %v891_v5 = vmul.f32 %v1876_v3, %v1876_v3  ;;  %v855_v6 = vmul.f32 %v854_v1, %v852_v61 }
 0x273   : > { %v867_v7 = vadd.f32 0.014752088, %v866_v4  ;;  %v892_v8 = vmin.f32 %v891_v5, 16.0  ;;  %v856_v12 = vadd.f32 0.0036580483, %v855_v6 }
 0x275   : > { %v868_v9 = vmul.f32 %v867_v7, %v852_v61  ;;  %v893_v10 = vmul.f32 2.1237322e-06, %v892_v8  ;;  %v904_v11 = vmul.f32 3.8918573e-05, %v892_v8  ;;  %v857_v18 = vmul.f32 %v856_v12, %v852_v61 }
 0x277   : > { %v869_v13 = vadd.f32 0.112945676, %v868_v9  ;;  %v894_v14 = vadd.f32 0.00028619796, %v893_v10  ;;  %v905_v41 = vadd.f32 0.001143296, %v904_v11 }
 0x278   : > { %v858_v22 = vadd.f32 0.05243302, %v857_v18  ;;  %v848_v9 = vmul.f32 0.5, %v1873_v30 }
 0x279   : > { %v870_v15 = vmul.f32 %v869_v13, %v852_v61  ;;  %v895_v16 = vmul.f32 %v894_v14, %v892_v8  ;;  %v906_v17 = vmul.f32 %v905_v41, %v892_v8 }
 0x27a   : > { %v859_v33 = vmul.f32 %v858_v22, %v852_v61 }
 0x27b   : > { %v871_v19 = vadd.f32 0.4994258, %v870_v15  ;;  %v896_v37 = vadd.f32 0.0036580483, %v895_v16  ;;  %v907_v21 = vadd.f32 0.014752088, %v906_v17 }
 0x27c   : > { %v860_v42 = vadd.f32 0.18741608, %v859_v33 }
 0x27d   : > { %v872_v23 = vmul.f32 %v871_v19, %v852_v61  ;;  %v908_v26 = vmul.f32 %v907_v21, %v892_v8  ;;  %v897_v24 = vmul.f32 %v896_v37, %v892_v8 }
 0x27e   : > { %v861_v43 = vmul.f32 %v860_v42, %v852_v61 }
 0x27f   : > { %v873_v27 = vadd.f32 1.0, %v872_v23  ;;  %v909_v31 = vadd.f32 0.112945676, %v908_v26  ;;  %v898_v36 = vadd.f32 0.05243302, %v897_v24 }
 0x280   : > { %v862_v52 = vadd.f32 1.1283791, %v861_v43 }
 0x281   : > { %1369 = vrcp.f32 %v873_v27  ;;  %v910_v32 = vmul.f32 %v909_v31, %v892_v8  ;;  %v899_v45 = vmul.f32 %v898_v36, %v892_v8  ;;  %v885_v48 = vand.u32 2147483648, %v873_v27 }
 0x282   : > { %v883_v50 = vand.u32 2147483647, %v873_v27  ;;  %vm879_vm1 = vweird.f32 %v873_v27  ;;  %v863_v35 = vmul.f32 %v862_v52, %v1869_v20 }
 0x283   : > { %v911_v38 = vadd.f32 0.4994258, %v910_v32  ;;  %v900_v49 = vadd.f32 0.18741608, %v899_v45  ;;  %v886_v55 = vor.u32 1.1754944e-38, %v885_v48 }
 0x284   : > { %vm884_vm3 = vcmp.eq.f32.partialorder %v883_v50, 8.507059e+37 }
 0x285   : > { %v912_v39 = vmul.f32 %v911_v38, %v892_v8  ;;  %v901_v56 = vmul.f32 %v900_v49, %v892_v8  ;;  %v847_v8 = vmul.f32 0.5, %v1866_v60 }
 0x287   : > { %v1370_v40 = vpop.eup %1369  ;;  %v913_v46 = vadd.f32 1.0, %v912_v39  ;;  %v902_v25 = vadd.f32 1.1283791, %v901_v56 }
 0x288   : > { %v875_v44 = vmul.f32 %v1370_v40, %v873_v27  ;;  %vm880_vm0 = vweird.f32 %v1370_v40 }
 0x289   : > { %1371 = vrcp.f32 %v913_v46  ;;  %vm881_vm2 = vmor %vm879_vm1, %vm880_vm0  ;;  %v925_v59 = vand.u32 2147483648, %v913_v46  ;;  %v923_v62 = vand.u32 2147483647, %v913_v46  ;;  %vm919_vm5 = vweird.f32 %v913_v46 }
 0x28a   : > { %v876_v29 = vsub.f32 1.0, %v875_v44  ;;  %v903_v2 = vmul.f32 %v902_v25, %v1876_v3 }
 0x28b   : > { %v926_v0 = vor.u32 1.1754944e-38, %v925_v59  ;;  %vm924_vm7 = vcmp.eq.f32.partialorder %v923_v62, 8.507059e+37 }
 0x28c   : > { %v877_v34 = vmul.f32 %v1370_v40, %v876_v29 }
 0x28e   : > { %v878_v51 = vadd.f32 %v1370_v40, %v877_v34 }
 0x28f   : > { %v1372_v53 = vpop.eup %1371 }
 0x290   : > { %v882_v54 = vsel %vm881_vm2, %v1370_v40, %v878_v51  ;;  %v915_v57 = vmul.f32 %v1372_v53, %v913_v46  ;;  %vm920_vm4 = vweird.f32 %v1372_v53 }
 0x291   : > { %v887_v47 = vsel %vm884_vm3, %v886_v55, %v882_v54  ;;  %vm921_vm6 = vmor %vm919_vm5, %vm920_vm4 }
 0x292   : > { %v916_v58 = vsub.f32 1.0, %v915_v57  ;;  %v888_v28 = vmul.f32 %v887_v47, %v863_v35 }
 0x294   : > { %v917_v61 = vmul.f32 %v1372_v53, %v916_v58  ;;  %v1219_v1 = vclamps-f32 %v888_v28, 1.0 }
 0x296   : > { %v918_v63 = vadd.f32 %v1372_v53, %v917_v61  ;;  %v931_v6 = vadd.f32 1.0, %v1219_v1 }
 0x298   : > { %v922_v4 = vsel %vm921_vm6, %v1372_v53, %v918_v63  ;;  %v933_v3 = vmul.f32 %v931_v6, %v847_v8 }
 0x299   : > { %v927_v20 = vsel %vm924_vm7, %v926_v0, %v922_v4 }
 0x29a   : > { %v928_v5 = vmul.f32 %v927_v20, %v903_v2 }
 0x29c   : > { %v1220_v7 = vclamps-f32 %v928_v5, 1.0 }
 0x29e   : > { %v932_v10 = vadd.f32 1.0, %v1220_v7 }
 0x2a0   : > { %v934_v11 = vmul.f32 %v932_v10, %v848_v9 }
 0x2a2   : > { %v1264_v12 = vpack.c.bf16 %v934_v11, %v933_v3 }
 0x2a4   : > { %1265 = vst [vmem:[%s362_s19] sm:$0xff] %v1264_v12  }
 0x2a5   : > { %1550 = shalt.err (!%p1547_p10)
}
 0x2a6   : > { %s1607_s14 = smov 64   ;;  %s1608_s9 = smov 4  }
 0x2a7   : > { %1284 = dma.vmem_to_hbm [thread:$0]  (%p1738_p0), %s953_s15, 128, %s955_s18, %s940_s28, %s1607_s14, %s1607_s14, %s1608_s9  }
 0x2a8 PF: > { %p1316_p11 = scmp.ge.s32.totalorder %s1597_s27, 2  ;;  %s969_s22 = sand.u32 1, %s1585_s24  }
 0x2a9   : > { %s970_s16 = scalar_lea.sflag [#allocation4], %s969_s22 }
 0x2aa   : > { %p1304_p12 = pnand %p1316_p11, %p1684_p6 }
 0x2ac   : > { %p1305_p13 = pneg %p1304_p12 }
 0x2ae   : > { %1580 = dma.done.wait (%p1305_p13), %s970_s16, 128  }
 0x2af   : > { %1582 = vsyncadd (%p1305_p13), %s970_s16, 4294967168  ;;  %p22_p3 = scmp.ge.s32.totalorder %s1728_s21, 5   ;;  %s1938_s24 = smov %s1589_s25 }
 0x2b0   : > { %s1939_s25 = smov %s1593_s26  ;;  %s1940_s26 = smov %s1744_s11 }
 0x2b1   : > { %s1941_s27 = smov %s1728_s21  ;;  %24 = sbr.rel (!%p22_p3) target bundleno = 9 (0x9), region = 109 }
 0x2b6   :  { %976 = vsyncpa [#allocation3], 1 }
 0x2b7   :  { %978 = vsyncpa [#allocation3 + $0x1], 1 }
 0x2b8   :  { %979 = vsyncpa [#allocation6], 1 }
 0x2b9   :  { %980 = vsyncpa [#allocation9], 1 }
 0x2ba   :  { %981 = vsyncpa [#allocation4], 1 }
 0x2bb   :  { %983 = vsyncpa [#allocation4 + $0x1], 1 }

</bundles_post_ra>
